<compile_context>
chip_gen: v7x
topology: tpu7x:2x2x1
jax: 0.10.0
libtpu: 0.0.40
codegen_flags: <defaults>
</compile_context>

<pallas_src>
import functools

import jax
import jax.numpy as jnp
from jax.experimental import pallas as pl
from jax.experimental.pallas import tpu as pltpu

NUM_FEATURES = 2
IN_DIM = NUM_FEATURES + 1   # 3
IN_PAD = 8                  # zero-pad K to a sublane multiple -> clean, exact MXU pass
HIDDEN = 128                # hidden_num (lane-aligned)
NUM_HIDDEN_LAYERS = 8       # hidden_layer_num
DEFAULT_BLOCK_B = 4096      # large batch tile: amortizes ~0.35 us/step grid overhead


def _round_up(n, m):
    return ((n + m - 1) // m) * m


def _choose_tiles(B, block_b):
    """Pick the number of grid steps first, then the tile, so a large block_b
    doesn't pad the batch up by (block_b - 1) wasted rows."""
    n = max(1, pl.cdiv(B, block_b))
    if B > 1024:
        # v7x megacore: need >= 2 grid steps (even count balances the two TCs);
        # on v5e/v6e the extra step costs ~0.35 us, negligible at this size.
        n = max(2, n)
        n += n % 2
    TB = _round_up(pl.cdiv(B, n), 8)     # sublane-aligned batch tile
    return n, TB


def _mlp_kernel(x_ref, w_in_ref, b_in_ref, w_hid_ref, b_hid_ref,
                w_out_ref, b_out_ref, o_ref):
    """One batch tile of the full MLP forward.

    x_ref:     [TB, 8]   f32  (cols 3..7 are zero padding)
    w_in_ref:  [8, H]    bf16   b_in_ref:  [1, H]    f32
    w_hid_ref: [L, H, H] bf16   b_hid_ref: [L, 1, H] f32
    w_out_ref: [1, H]    f32    b_out_ref: [1, 1]    f32
    o_ref:     [TB, 1]   f32
    """
    # --- input layer: one (nearly empty) bf16 MXU pass; overlaps with VPU work and
    #     avoids 3*TB/8 serial cross-lane broadcasts. f32 bias-add + ReLU, then the
    #     carried activation is bf16.
    h = jnp.dot(x_ref[...].astype(jnp.bfloat16), w_in_ref[...],
                preferred_element_type=jnp.float32)
    h = jnp.maximum(h + b_in_ref[...], 0.0).astype(jnp.bfloat16)      # [TB, H] bf16

    # --- 8 hidden layers: bf16 operands on the MXU, f32 accumulation; bias-add + ReLU
    #     on the f32 accumulator (VPU), then cast so the value crossing each layer
    #     boundary is bf16 (half the spill/reload traffic). Static unroll kept for LLO
    #     visibility; switch to lax.fori_loop only if the bundle dump shows spills.
    for i in range(NUM_HIDDEN_LAYERS):
        acc = jnp.dot(h, w_hid_ref[i], preferred_element_type=jnp.float32)
        h = jnp.maximum(acc + b_hid_ref[i], 0.0).astype(jnp.bfloat16)

    # --- output layer (N=1): f32 VPU multiply + lane reduction instead of an MXU
    #     matvec. [TB, 1] store is a masked vst; lane-dense rewrite gated on profiling.
    out = jnp.sum(h.astype(jnp.float32) * w_out_ref[...], axis=-1, keepdims=True)
    o_ref[...] = (out + b_out_ref[...]).astype(o_ref.dtype)


@functools.partial(jax.jit, static_argnames=("block_b",))
def net_forward(x, w_in, b_in, w_hid, b_hid, w_out, b_out, *, block_b=DEFAULT_BLOCK_B):
    B = x.shape[0]
    n_tiles, TB = _choose_tiles(B, block_b)
    B_pad = n_tiles * TB

    # Pad the batch to the tile grid and K to 8 (zero columns / zero weight rows keep
    # the padded matmul exact). Padded batch rows are sliced off at the end.
    x_p = jnp.pad(x, ((0, B_pad - B), (0, IN_PAD - IN_DIM)))
    w_in_p = jnp.pad(w_in, ((0, IN_PAD - IN_DIM), (0, 0))).astype(jnp.bfloat16)

    # bf16 weights for the MXU layers (halves resident weight footprint); biases and
    # the tiny output layer stay f32.
    w_hid_bf16 = w_hid.astype(jnp.bfloat16)
    w_out_row = w_out.reshape(1, HIDDEN).astype(jnp.float32)   # [1, H] for VPU reduce

    def weight_spec(shape):
        # Constant index_map -> block stays resident in VMEM across grid steps.
        return pl.BlockSpec(shape, lambda i: (0,) * len(shape))

    flops = 2 * B_pad * (IN_PAD * HIDDEN
                         + NUM_HIDDEN_LAYERS * HIDDEN * HIDDEN
                         + HIDDEN)
    bytes_accessed = (x_p.size * 4                       # input
                      + B_pad * 4                        # output
                      + (w_in_p.size + w_hid_bf16.size) * 2   # bf16 weights
                      + (b_in.size + b_hid.size
                         + w_out_row.size + b_out.size) * 4)

    out = pl.pallas_call(
        _mlp_kernel,
        out_shape=jax.ShapeDtypeStruct((B_pad, 1), jnp.float32),
        grid=(n_tiles,),
        in_specs=[
            pl.BlockSpec((TB, IN_PAD), lambda i: (i, 0)),               # x: batch-tiled
            weight_spec((IN_PAD, HIDDEN)),                              # w_in (bf16)
            weight_spec((1, HIDDEN)),                                   # b_in
            weight_spec((NUM_HIDDEN_LAYERS, HIDDEN, HIDDEN)),           # w_hid (bf16)
            weight_spec((NUM_HIDDEN_LAYERS, 1, HIDDEN)),                # b_hid
            weight_spec((1, HIDDEN)),                                   # w_out row
            weight_spec((1, 1)),                                        # b_out
        ],
        out_specs=pl.BlockSpec((TB, 1), lambda i: (i, 0)),
        compiler_params=pltpu.CompilerParams(
            # Batch tiles are independent -> megacore-shardable on v7x.
            dimension_semantics=("parallel",),
            # ~12-16 MiB peak at TB=4096 (lane-padded x/out buffers + activations);
            # explicit limit covers v5e's 16 MiB scoped default and v7x's 32 MiB.
            vmem_limit_bytes=32 * 1024 * 1024,
        ),
        cost_estimate=pl.CostEstimate(
            flops=flops, transcendentals=0, bytes_accessed=bytes_accessed),
    )(x_p, w_in_p, b_in, w_hid_bf16, b_hid, w_out_row, b_out)

    return out[:B]


def init_params(key):
    """Deterministic init mimicking torch.nn.Linear default (U[-1/sqrt(fan_in), +])."""
    ks = jax.random.split(key, 6)

    def uni(k, shape, fan_in):
        bound = 1.0 / jnp.sqrt(jnp.float32(fan_in))
        return jax.random.uniform(k, shape, jnp.float32, -bound, bound)

    w_in = uni(ks[0], (IN_DIM, HIDDEN), IN_DIM)                        # [3, H]
    b_in = uni(ks[1], (1, HIDDEN), IN_DIM)                             # [1, H]
    w_hid = uni(ks[2], (NUM_HIDDEN_LAYERS, HIDDEN, HIDDEN), HIDDEN)    # [L, H, H]
    b_hid = uni(ks[3], (NUM_HIDDEN_LAYERS, 1, HIDDEN), HIDDEN)         # [L, 1, H]
    w_out = uni(ks[4], (HIDDEN, 1), HIDDEN)                            # [H, 1]
    b_out = uni(ks[5], (1, 1), HIDDEN)                                 # [1, 1]
    return w_in, b_in, w_hid, b_hid, w_out, b_out


def reference_forward(x, w_in, b_in, w_hid, b_hid, w_out, b_out, *, bf16=False):
    """Pure-JAX reference. bf16=True mirrors the kernel's precision path exactly
    (bf16 matmul operands + bf16-carried activations, f32 accumulation/bias/ReLU)."""
    if bf16:
        h = jnp.dot(x.astype(jnp.bfloat16), w_in.astype(jnp.bfloat16),
                    preferred_element_type=jnp.float32)
    else:
        h = x @ w_in
    h = jnp.maximum(h + b_in, 0.0)
    if bf16:
        h = h.astype(jnp.bfloat16)
    for i in range(NUM_HIDDEN_LAYERS):
        rhs = w_hid[i].astype(jnp.bfloat16) if bf16 else w_hid[i]
        acc = jnp.dot(h, rhs, preferred_element_type=jnp.float32)
        h = jnp.maximum(acc + b_hid[i], 0.0)
        if bf16:
            h = h.astype(jnp.bfloat16)
    return jnp.dot(h.astype(jnp.float32), w_out,
                   precision=jax.lax.Precision.HIGHEST) + b_out


if __name__ == "__main__":
    key = jax.random.PRNGKey(0)
    k_params, k_x = jax.random.split(key)

    params = init_params(k_params)
    batch = 8
    x = jax.random.normal(k_x, (batch, IN_DIM), jnp.float32)

    out = jax.block_until_ready(net_forward(x, *params))
    assert out.shape == (batch, 1), out.shape

    # Precision-matched reference (bf16 operands / carried activations) — tight check.
    ref_bf16 = reference_forward(x, *params, bf16=True)
    assert jnp.allclose(out, ref_bf16, atol=2e-3, rtol=2e-3), "mismatch vs bf16 reference"

    # Full-f32 reference — loose sanity check (bf16 MXU operands lose ~8 mantissa bits).
    ref_f32 = reference_forward(x, *params, bf16=False)
    assert jnp.allclose(out, ref_f32, atol=1e-1, rtol=1e-1), "mismatch vs f32 reference"

    print("KERNEL_OK")
</pallas_src>

<mosaic_0001>
module attributes {stable_mosaic.version = 11 : i64} {
  func.func @_mlp_kernel(%arg0: i32, %arg1: memref<8x8xf32, #tpu.memory_space<vmem>>, %arg2: memref<8x128xbf16, #tpu.memory_space<vmem>>, %arg3: memref<1x128xf32, #tpu.memory_space<vmem>>, %arg4: memref<8x128x128xbf16, #tpu.memory_space<vmem>>, %arg5: memref<8x1x128xf32, #tpu.memory_space<vmem>>, %arg6: memref<1x128xf32, #tpu.memory_space<vmem>>, %arg7: memref<1x1xf32, #tpu.memory_space<vmem>>, %arg8: memref<8x1xf32, #tpu.memory_space<vmem>>) attributes {dimension_semantics = [#tpu.dimension_semantics<parallel>], iteration_bounds = array<i64: 1>, scalar_prefetch = 0 : i64, scratch_operands = 0 : i64, tpu.core_type = #tpu.core_type<tc>, window_params = [{transform_indices = @transform_0, window_bounds = array<i64: 8, 8>}, {pipeline_mode = #tpu.pipeline_mode<synchronous>, transform_indices = @transform_1, window_bounds = array<i64: 8, 128>}, {pipeline_mode = #tpu.pipeline_mode<synchronous>, transform_indices = @transform_2, window_bounds = array<i64: 1, 128>}, {pipeline_mode = #tpu.pipeline_mode<synchronous>, transform_indices = @transform_3, window_bounds = array<i64: 8, 128, 128>}, {pipeline_mode = #tpu.pipeline_mode<synchronous>, transform_indices = @transform_4, window_bounds = array<i64: 8, 1, 128>}, {pipeline_mode = #tpu.pipeline_mode<synchronous>, transform_indices = @transform_5, window_bounds = array<i64: 1, 128>}, {pipeline_mode = #tpu.pipeline_mode<synchronous>, transform_indices = @transform_6, window_bounds = array<i64: 1, 1>}, {transform_indices = @transform_7, window_bounds = array<i64: 8, 1>}]} {
    %c0 = arith.constant 0 : index
    %c0_0 = arith.constant 0 : index
    %0 = vector.load %arg1[%c0, %c0_0] : memref<8x8xf32, #tpu.memory_space<vmem>>, vector<8x8xf32>
    %1 = arith.truncf %0 : vector<8x8xf32> to vector<8x8xbf16>
    %c0_1 = arith.constant 0 : index
    %c0_2 = arith.constant 0 : index
    %2 = vector.load %arg2[%c0_1, %c0_2] : memref<8x128xbf16, #tpu.memory_space<vmem>>, vector<8x128xbf16>
    %cst = arith.constant dense<0.000000e+00> : vector<8x128xf32>
    %3 = tpu.matmul %1, %2, %cst {dimension_numbers = #tpu.dot_dimension_numbers<[1], [0], [0], [1], [0, 0, 1, 1], [], []>} : vector<8x8xbf16>, vector<8x128xbf16>, vector<8x128xf32> -> vector<8x128xf32>
    %c0_3 = arith.constant 0 : index
    %c0_4 = arith.constant 0 : index
    %4 = vector.load %arg3[%c0_3, %c0_4] : memref<1x128xf32, #tpu.memory_space<vmem>>, vector<1x128xf32>
    %5 = vector.broadcast %4 : vector<1x128xf32> to vector<8x128xf32>
    %6 = arith.addf %3, %5 : vector<8x128xf32>
    %cst_5 = arith.constant 0.000000e+00 : f32
    %7 = vector.broadcast %cst_5 : f32 to vector<8x128xf32>
    %8 = arith.maximumf %6, %7 : vector<8x128xf32>
    %9 = arith.truncf %8 : vector<8x128xf32> to vector<8x128xbf16>
    %c0_6 = arith.constant 0 : index
    %c0_7 = arith.constant 0 : index
    %c0_8 = arith.constant 0 : index
    %10 = vector.load %arg4[%c0_6, %c0_7, %c0_8] : memref<8x128x128xbf16, #tpu.memory_space<vmem>>, vector<1x128x128xbf16>
    %11 = vector.shape_cast %10 : vector<1x128x128xbf16> to vector<128x128xbf16>
    %cst_9 = arith.constant dense<0.000000e+00> : vector<8x128xf32>
    %12 = tpu.matmul %9, %11, %cst_9 {dimension_numbers = #tpu.dot_dimension_numbers<[1], [0], [0], [1], [0, 0, 1, 1], [], []>} : vector<8x128xbf16>, vector<128x128xbf16>, vector<8x128xf32> -> vector<8x128xf32>
    %c0_10 = arith.constant 0 : index
    %c0_11 = arith.constant 0 : index
    %c0_12 = arith.constant 0 : index
    %13 = vector.load %arg5[%c0_10, %c0_11, %c0_12] : memref<8x1x128xf32, #tpu.memory_space<vmem>>, vector<1x1x128xf32>
    %14 = vector.shape_cast %13 : vector<1x1x128xf32> to vector<1x128xf32>
    %15 = vector.broadcast %14 : vector<1x128xf32> to vector<8x128xf32>
    %16 = arith.addf %12, %15 : vector<8x128xf32>
    %cst_13 = arith.constant 0.000000e+00 : f32
    %17 = vector.broadcast %cst_13 : f32 to vector<8x128xf32>
    %18 = arith.maximumf %16, %17 : vector<8x128xf32>
    %19 = arith.truncf %18 : vector<8x128xf32> to vector<8x128xbf16>
    %c1 = arith.constant 1 : index
    %c0_14 = arith.constant 0 : index
    %c0_15 = arith.constant 0 : index
    %20 = vector.load %arg4[%c1, %c0_14, %c0_15] : memref<8x128x128xbf16, #tpu.memory_space<vmem>>, vector<1x128x128xbf16>
    %21 = vector.shape_cast %20 : vector<1x128x128xbf16> to vector<128x128xbf16>
    %cst_16 = arith.constant dense<0.000000e+00> : vector<8x128xf32>
    %22 = tpu.matmul %19, %21, %cst_16 {dimension_numbers = #tpu.dot_dimension_numbers<[1], [0], [0], [1], [0, 0, 1, 1], [], []>} : vector<8x128xbf16>, vector<128x128xbf16>, vector<8x128xf32> -> vector<8x128xf32>
    %c1_17 = arith.constant 1 : index
    %c0_18 = arith.constant 0 : index
    %c0_19 = arith.constant 0 : index
    %23 = vector.load %arg5[%c1_17, %c0_18, %c0_19] : memref<8x1x128xf32, #tpu.memory_space<vmem>>, vector<1x1x128xf32>
    %24 = vector.shape_cast %23 : vector<1x1x128xf32> to vector<1x128xf32>
    %25 = vector.broadcast %24 : vector<1x128xf32> to vector<8x128xf32>
    %26 = arith.addf %22, %25 : vector<8x128xf32>
    %cst_20 = arith.constant 0.000000e+00 : f32
    %27 = vector.broadcast %cst_20 : f32 to vector<8x128xf32>
    %28 = arith.maximumf %26, %27 : vector<8x128xf32>
    %29 = arith.truncf %28 : vector<8x128xf32> to vector<8x128xbf16>
    %c2 = arith.constant 2 : index
    %c0_21 = arith.constant 0 : index
    %c0_22 = arith.constant 0 : index
    %30 = vector.load %arg4[%c2, %c0_21, %c0_22] : memref<8x128x128xbf16, #tpu.memory_space<vmem>>, vector<1x128x128xbf16>
    %31 = vector.shape_cast %30 : vector<1x128x128xbf16> to vector<128x128xbf16>
    %cst_23 = arith.constant dense<0.000000e+00> : vector<8x128xf32>
    %32 = tpu.matmul %29, %31, %cst_23 {dimension_numbers = #tpu.dot_dimension_numbers<[1], [0], [0], [1], [0, 0, 1, 1], [], []>} : vector<8x128xbf16>, vector<128x128xbf16>, vector<8x128xf32> -> vector<8x128xf32>
    %c2_24 = arith.constant 2 : index
    %c0_25 = arith.constant 0 : index
    %c0_26 = arith.constant 0 : index
    %33 = vector.load %arg5[%c2_24, %c0_25, %c0_26] : memref<8x1x128xf32, #tpu.memory_space<vmem>>, vector<1x1x128xf32>
    %34 = vector.shape_cast %33 : vector<1x1x128xf32> to vector<1x128xf32>
    %35 = vector.broadcast %34 : vector<1x128xf32> to vector<8x128xf32>
    %36 = arith.addf %32, %35 : vector<8x128xf32>
    %cst_27 = arith.constant 0.000000e+00 : f32
    %37 = vector.broadcast %cst_27 : f32 to vector<8x128xf32>
    %38 = arith.maximumf %36, %37 : vector<8x128xf32>
    %39 = arith.truncf %38 : vector<8x128xf32> to vector<8x128xbf16>
    %c3 = arith.constant 3 : index
    %c0_28 = arith.constant 0 : index
    %c0_29 = arith.constant 0 : index
    %40 = vector.load %arg4[%c3, %c0_28, %c0_29] : memref<8x128x128xbf16, #tpu.memory_space<vmem>>, vector<1x128x128xbf16>
    %41 = vector.shape_cast %40 : vector<1x128x128xbf16> to vector<128x128xbf16>
    %cst_30 = arith.constant dense<0.000000e+00> : vector<8x128xf32>
    %42 = tpu.matmul %39, %41, %cst_30 {dimension_numbers = #tpu.dot_dimension_numbers<[1], [0], [0], [1], [0, 0, 1, 1], [], []>} : vector<8x128xbf16>, vector<128x128xbf16>, vector<8x128xf32> -> vector<8x128xf32>
    %c3_31 = arith.constant 3 : index
    %c0_32 = arith.constant 0 : index
    %c0_33 = arith.constant 0 : index
    %43 = vector.load %arg5[%c3_31, %c0_32, %c0_33] : memref<8x1x128xf32, #tpu.memory_space<vmem>>, vector<1x1x128xf32>
    %44 = vector.shape_cast %43 : vector<1x1x128xf32> to vector<1x128xf32>
    %45 = vector.broadcast %44 : vector<1x128xf32> to vector<8x128xf32>
    %46 = arith.addf %42, %45 : vector<8x128xf32>
    %cst_34 = arith.constant 0.000000e+00 : f32
    %47 = vector.broadcast %cst_34 : f32 to vector<8x128xf32>
    %48 = arith.maximumf %46, %47 : vector<8x128xf32>
    %49 = arith.truncf %48 : vector<8x128xf32> to vector<8x128xbf16>
    %c4 = arith.constant 4 : index
    %c0_35 = arith.constant 0 : index
    %c0_36 = arith.constant 0 : index
    %50 = vector.load %arg4[%c4, %c0_35, %c0_36] : memref<8x128x128xbf16, #tpu.memory_space<vmem>>, vector<1x128x128xbf16>
    %51 = vector.shape_cast %50 : vector<1x128x128xbf16> to vector<128x128xbf16>
    %cst_37 = arith.constant dense<0.000000e+00> : vector<8x128xf32>
    %52 = tpu.matmul %49, %51, %cst_37 {dimension_numbers = #tpu.dot_dimension_numbers<[1], [0], [0], [1], [0, 0, 1, 1], [], []>} : vector<8x128xbf16>, vector<128x128xbf16>, vector<8x128xf32> -> vector<8x128xf32>
    %c4_38 = arith.constant 4 : index
    %c0_39 = arith.constant 0 : index
    %c0_40 = arith.constant 0 : index
    %53 = vector.load %arg5[%c4_38, %c0_39, %c0_40] : memref<8x1x128xf32, #tpu.memory_space<vmem>>, vector<1x1x128xf32>
    %54 = vector.shape_cast %53 : vector<1x1x128xf32> to vector<1x128xf32>
    %55 = vector.broadcast %54 : vector<1x128xf32> to vector<8x128xf32>
    %56 = arith.addf %52, %55 : vector<8x128xf32>
    %cst_41 = arith.constant 0.000000e+00 : f32
    %57 = vector.broadcast %cst_41 : f32 to vector<8x128xf32>
    %58 = arith.maximumf %56, %57 : vector<8x128xf32>
    %59 = arith.truncf %58 : vector<8x128xf32> to vector<8x128xbf16>
    %c5 = arith.constant 5 : index
    %c0_42 = arith.constant 0 : index
    %c0_43 = arith.constant 0 : index
    %60 = vector.load %arg4[%c5, %c0_42, %c0_43] : memref<8x128x128xbf16, #tpu.memory_space<vmem>>, vector<1x128x128xbf16>
    %61 = vector.shape_cast %60 : vector<1x128x128xbf16> to vector<128x128xbf16>
    %cst_44 = arith.constant dense<0.000000e+00> : vector<8x128xf32>
    %62 = tpu.matmul %59, %61, %cst_44 {dimension_numbers = #tpu.dot_dimension_numbers<[1], [0], [0], [1], [0, 0, 1, 1], [], []>} : vector<8x128xbf16>, vector<128x128xbf16>, vector<8x128xf32> -> vector<8x128xf32>
    %c5_45 = arith.constant 5 : index
    %c0_46 = arith.constant 0 : index
    %c0_47 = arith.constant 0 : index
    %63 = vector.load %arg5[%c5_45, %c0_46, %c0_47] : memref<8x1x128xf32, #tpu.memory_space<vmem>>, vector<1x1x128xf32>
    %64 = vector.shape_cast %63 : vector<1x1x128xf32> to vector<1x128xf32>
    %65 = vector.broadcast %64 : vector<1x128xf32> to vector<8x128xf32>
    %66 = arith.addf %62, %65 : vector<8x128xf32>
    %cst_48 = arith.constant 0.000000e+00 : f32
    %67 = vector.broadcast %cst_48 : f32 to vector<8x128xf32>
    %68 = arith.maximumf %66, %67 : vector<8x128xf32>
    %69 = arith.truncf %68 : vector<8x128xf32> to vector<8x128xbf16>
    %c6 = arith.constant 6 : index
    %c0_49 = arith.constant 0 : index
    %c0_50 = arith.constant 0 : index
    %70 = vector.load %arg4[%c6, %c0_49, %c0_50] : memref<8x128x128xbf16, #tpu.memory_space<vmem>>, vector<1x128x128xbf16>
    %71 = vector.shape_cast %70 : vector<1x128x128xbf16> to vector<128x128xbf16>
    %cst_51 = arith.constant dense<0.000000e+00> : vector<8x128xf32>
    %72 = tpu.matmul %69, %71, %cst_51 {dimension_numbers = #tpu.dot_dimension_numbers<[1], [0], [0], [1], [0, 0, 1, 1], [], []>} : vector<8x128xbf16>, vector<128x128xbf16>, vector<8x128xf32> -> vector<8x128xf32>
    %c6_52 = arith.constant 6 : index
    %c0_53 = arith.constant 0 : index
    %c0_54 = arith.constant 0 : index
    %73 = vector.load %arg5[%c6_52, %c0_53, %c0_54] : memref<8x1x128xf32, #tpu.memory_space<vmem>>, vector<1x1x128xf32>
    %74 = vector.shape_cast %73 : vector<1x1x128xf32> to vector<1x128xf32>
    %75 = vector.broadcast %74 : vector<1x128xf32> to vector<8x128xf32>
    %76 = arith.addf %72, %75 : vector<8x128xf32>
    %cst_55 = arith.constant 0.000000e+00 : f32
    %77 = vector.broadcast %cst_55 : f32 to vector<8x128xf32>
    %78 = arith.maximumf %76, %77 : vector<8x128xf32>
    %79 = arith.truncf %78 : vector<8x128xf32> to vector<8x128xbf16>
    %c7 = arith.constant 7 : index
    %c0_56 = arith.constant 0 : index
    %c0_57 = arith.constant 0 : index
    %80 = vector.load %arg4[%c7, %c0_56, %c0_57] : memref<8x128x128xbf16, #tpu.memory_space<vmem>>, vector<1x128x128xbf16>
    %81 = vector.shape_cast %80 : vector<1x128x128xbf16> to vector<128x128xbf16>
    %cst_58 = arith.constant dense<0.000000e+00> : vector<8x128xf32>
    %82 = tpu.matmul %79, %81, %cst_58 {dimension_numbers = #tpu.dot_dimension_numbers<[1], [0], [0], [1], [0, 0, 1, 1], [], []>} : vector<8x128xbf16>, vector<128x128xbf16>, vector<8x128xf32> -> vector<8x128xf32>
    %c7_59 = arith.constant 7 : index
    %c0_60 = arith.constant 0 : index
    %c0_61 = arith.constant 0 : index
    %83 = vector.load %arg5[%c7_59, %c0_60, %c0_61] : memref<8x1x128xf32, #tpu.memory_space<vmem>>, vector<1x1x128xf32>
    %84 = vector.shape_cast %83 : vector<1x1x128xf32> to vector<1x128xf32>
    %85 = vector.broadcast %84 : vector<1x128xf32> to vector<8x128xf32>
    %86 = arith.addf %82, %85 : vector<8x128xf32>
    %cst_62 = arith.constant 0.000000e+00 : f32
    %87 = vector.broadcast %cst_62 : f32 to vector<8x128xf32>
    %88 = arith.maximumf %86, %87 : vector<8x128xf32>
    %89 = arith.truncf %88 : vector<8x128xf32> to vector<8x128xbf16>
    %90 = arith.extf %89 : vector<8x128xbf16> to vector<8x128xf32>
    %c0_63 = arith.constant 0 : index
    %c0_64 = arith.constant 0 : index
    %91 = vector.load %arg6[%c0_63, %c0_64] : memref<1x128xf32, #tpu.memory_space<vmem>>, vector<1x128xf32>
    %92 = vector.broadcast %91 : vector<1x128xf32> to vector<8x128xf32>
    %93 = arith.mulf %90, %92 : vector<8x128xf32>
    %cst_65 = arith.constant dense<0.000000e+00> : vector<8xf32>
    %94 = vector.multi_reduction <add>, %93, %cst_65 [1] : vector<8x128xf32> to vector<8xf32>
    %95 = vector.shape_cast %94 : vector<8xf32> to vector<8x1xf32>
    %c0_66 = arith.constant 0 : index
    %c0_67 = arith.constant 0 : index
    %96 = vector.load %arg7[%c0_66, %c0_67] : memref<1x1xf32, #tpu.memory_space<vmem>>, vector<1x1xf32>
    %97 = vector.broadcast %96 : vector<1x1xf32> to vector<8x1xf32>
    %98 = arith.addf %95, %97 : vector<8x1xf32>
    %c0_68 = arith.constant 0 : index
    %c0_69 = arith.constant 0 : index
    %99 = vector.load %arg8[%c0_68, %c0_69] : memref<8x1xf32, #tpu.memory_space<vmem>>, vector<8x1xf32>
    tpu.vector_store %arg8[%c0_68, %c0_69], %98 {strides = array<i32>} : memref<8x1xf32, #tpu.memory_space<vmem>>, vector<8x1xf32>,
    return
  }
  func.func @transform_0(%arg0: i32) -> (i32, i32) {
    %c0_i32 = arith.constant 0 : i32
    %c0_i32_0 = arith.constant 0 : i32
    return %arg0, %c0_i32 : i32, i32
  }
  func.func @transform_1(%arg0: i32) -> (i32, i32) {
    %c0_i32 = arith.constant 0 : i32
    %c0_i32_0 = arith.constant 0 : i32
    %c0_i32_1 = arith.constant 0 : i32
    return %c0_i32, %c0_i32_0 : i32, i32
  }
  func.func @transform_2(%arg0: i32) -> (i32, i32) {
    %c0_i32 = arith.constant 0 : i32
    %c0_i32_0 = arith.constant 0 : i32
    %c0_i32_1 = arith.constant 0 : i32
    return %c0_i32, %c0_i32_0 : i32, i32
  }
  func.func @transform_3(%arg0: i32) -> (i32, i32, i32) {
    %c0_i32 = arith.constant 0 : i32
    %c0_i32_0 = arith.constant 0 : i32
    %c0_i32_1 = arith.constant 0 : i32
    %c0_i32_2 = arith.constant 0 : i32
    return %c0_i32, %c0_i32_0, %c0_i32_1 : i32, i32, i32
  }
  func.func @transform_4(%arg0: i32) -> (i32, i32, i32) {
    %c0_i32 = arith.constant 0 : i32
    %c0_i32_0 = arith.constant 0 : i32
    %c0_i32_1 = arith.constant 0 : i32
    %c0_i32_2 = arith.constant 0 : i32
    return %c0_i32, %c0_i32_0, %c0_i32_1 : i32, i32, i32
  }
  func.func @transform_5(%arg0: i32) -> (i32, i32) {
    %c0_i32 = arith.constant 0 : i32
    %c0_i32_0 = arith.constant 0 : i32
    %c0_i32_1 = arith.constant 0 : i32
    return %c0_i32, %c0_i32_0 : i32, i32
  }
  func.func @transform_6(%arg0: i32) -> (i32, i32) {
    %c0_i32 = arith.constant 0 : i32
    %c0_i32_0 = arith.constant 0 : i32
    %c0_i32_1 = arith.constant 0 : i32
    return %c0_i32, %c0_i32_0 : i32, i32
  }
  func.func @transform_7(%arg0: i32) -> (i32, i32) {
    %c0_i32 = arith.constant 0 : i32
    %c0_i32_0 = arith.constant 0 : i32
    return %arg0, %c0_i32 : i32, i32
  }
}

</mosaic_0001>

<bundles_post_ra>
// kernel: net_forward.1
= control target key start
LH: loop header
LB: loop body
LE: loop exit
PB: predicated region body
PF: predicated region fallthrough
CT: control target
= control target key end

     0   :  { %vm43_vm0 = vcmask 1043456   ;;  %v1533_v0 = vmov 0.0   ;;  %vm1534_vm1 = vmmov 0   ;;  %vm39_vm2 = vcmask 64512   ;;  %s1892_s1 = inlined_call_operand.vmem [shape: bf16[8,128], index: 1, kind: input, shape index: {}]   ;;  %s1893_s0 = inlined_call_operand.vmem [shape: f32[8,8], index: 0, kind: input, shape index: {}]   ;;  %s1894_s3 = inlined_call_operand.vmem [shape: bf16[8,128,128], index: 3, kind: input, shape index: {}]   ;;  %s1895_s2 = inlined_call_operand.vmem [shape: f32[1,128], index: 2, kind: input, shape index: {}]   ;;  %s1896_s4 = inlined_call_operand.vmem [shape: f32[8,1,128], index: 4, kind: input, shape index: {}]   ;;  %s1897_s6 = inlined_call_operand.<no memory space> [shape: f32[1,1], index: 6, kind: input, shape index: {}]   ;;  %s1898_s5 = inlined_call_operand.vmem [shape: f32[1,128], index: 5, kind: input, shape index: {}]   ;;  %s1899_s7 = inlined_call_operand.vmem [shape: f32[8,1], index: 7, kind: output, shape index: {}]  }
   0x1   :  { %1301 = vmatprep.subr.bf16.mxu0 %v1533_v0  ;;  %v31_v1 = vld [vmem:[%s1892_s1] sm:$0xf]  ;;  %1303 = vmatprep.mubr.msk.bf16.mxu0 %vm1534_vm1, %v1533_v0  ;;  %v1470_v6 = vld [vmem:[%s1894_s3 + $0x8] sm:$0xff]   ;;  %v1471_v7 = vld [vmem:[%s1894_s3 + $0x10] sm:$0xff]   ;;  %vm1026_vm3 = vcmask 7168  }
   0x2   :  { %v29_v2 = vld [vmem:[%s1893_s0] sm:$0xff]  ;;  %v45_v3 = vsel %vm43_vm0, %v31_v1, 0  ;;  %1307 = vmatprep.subr.bf16.mxu1 %v1533_v0  ;;  %1323 = vmatprep.mubr.msk.bf16.mxu1 %vm1534_vm1, %v1533_v0  ;;  %v1472_v8 = vld [vmem:[%s1894_s3 + $0x18] sm:$0xff]   ;;  %v1474_v10 = vld [vmem:[%s1894_s3 + $0x28] sm:$0xff]  }
   0x3   :  { %v30_v4 = vpack.c.bf16 %v29_v2, %v29_v2  ;;  %v1469_v5 = vld [vmem:[%s1894_s3] sm:$0xff]   ;;  %1302 = vmatpush3.bf16.msra.mxu0 %v45_v3  ;;  %v1475_v11 = vld [vmem:[%s1894_s3 + $0x30] sm:$0xff]   ;;  %v1476_v12 = vld [vmem:[%s1894_s3 + $0x38] sm:$0xff]  }
   0x4   :  { %1308 = vmatpush3.bf16.msra.mxu1 %v1469_v5  ;;  %1327 = vmatprep.subr.bf16.mxu0 %v1533_v0  ;;  %v1473_v9 = vld [vmem:[%s1894_s3 + $0x20] sm:$0xff]   ;;  %v1478_v14 = vld [vmem:[%s1894_s3 + $0x48] sm:$0xff]   ;;  %v1479_v15 = vld [vmem:[%s1894_s3 + $0x50] sm:$0xff]  }
   0x5   :  { %1309 = vmatprep.subr.bf16.mxu1 %v1533_v0  ;;  %v1477_v13 = vld [vmem:[%s1894_s3 + $0x40] sm:$0xff]   ;;  %v1480_v16 = vld [vmem:[%s1894_s3 + $0x58] sm:$0xff]   ;;  %v1482_v18 = vld [vmem:[%s1894_s3 + $0x68] sm:$0xff]  }
   0x6   :  { %1304 = vmatmul.mubr.msk.bf16.vlgmr.msra.gmra.mrb[0].mxu0 %vm39_vm2, %v30_v4  ;;  %v1481_v17 = vld [vmem:[%s1894_s3 + $0x60] sm:$0xff]   ;;  %v1483_v27 = vld [vmem:[%s1894_s3 + $0x70] sm:$0xff]   ;;  %v1484_v28 = vld [vmem:[%s1894_s3 + $0x78] sm:$0xff]  }
   0x7   :  { %1343 = vmatprep.mubr.msk.bf16.mxu0 %vm1534_vm1, %v1533_v0  ;;  %1328 = vmatpush3.bf16.msra.mxu0 %v1477_v13  ;;  %v1032_v19 = vld [vmem:[%s1895_s2] ss:$0 sm:$0xff]  ;;  %v1486_v30 = vld [vmem:[%s1894_s3 + $0x88] sm:$0xff]   ;;  %v1487_v31 = vld [vmem:[%s1894_s3 + $0x90] sm:$0xff]  }
   0x8   :  { %1310 = vmatpush3.bf16.msra.mxu1 %v1470_v6  ;;  %1329 = vmatprep.subr.bf16.mxu0 %v1533_v0  ;;  %v1485_v29 = vld [vmem:[%s1894_s3 + $0x80] sm:$0xff]   ;;  %v1488_v32 = vld [vmem:[%s1894_s3 + $0x98] sm:$0xff]   ;;  %v1490_v34 = vld [vmem:[%s1894_s3 + $0xa8] sm:$0xff]  }
   0x9   :  { %1311 = vmatprep.subr.bf16.mxu1 %v1533_v0  ;;  %v1489_v33 = vld [vmem:[%s1894_s3 + $0xa0] sm:$0xff]   ;;  %v1491_v43 = vld [vmem:[%s1894_s3 + $0xb0] sm:$0xff]   ;;  %v1492_v44 = vld [vmem:[%s1894_s3 + $0xb8] sm:$0xff]  }
   0xa   :  { %v1034_v35 = vld [vmem:[%s1896_s4] ss:$0 sm:$0xff]  ;;  %v1494_v46 = vld [vmem:[%s1894_s3 + $0xc8] sm:$0xff]   ;;  %v1495_v47 = vld [vmem:[%s1894_s3 + $0xd0] sm:$0xff]  }
   0xb   :  { %1330 = vmatpush3.bf16.msra.mxu0 %v1478_v14  ;;  %v1493_v45 = vld [vmem:[%s1894_s3 + $0xc0] sm:$0xff]   ;;  %v1496_v48 = vld [vmem:[%s1894_s3 + $0xd8] sm:$0xff]   ;;  %v1498_v50 = vld [vmem:[%s1894_s3 + $0xe8] sm:$0xff]  }
   0xc   :  { %1312 = vmatpush3.bf16.msra.mxu1 %v1471_v7  ;;  %1331 = vmatprep.subr.bf16.mxu0 %v1533_v0  ;;  %v1497_v49 = vld [vmem:[%s1894_s3 + $0xe0] sm:$0xff]   ;;  %v1499_v59 = vld [vmem:[%s1894_s3 + $0xf0] sm:$0xff]   ;;  %v1500_v60 = vld [vmem:[%s1894_s3 + $0xf8] sm:$0xff]  }
   0xd   :  { %1313 = vmatprep.subr.bf16.mxu1 %v1533_v0  ;;  %v1060_v51 = vld [vmem:[%s1896_s4 + $0x1] ss:$0 sm:$0xff]  ;;  %v1502_v62 = vld [vmem:[%s1894_s3 + $0x108] sm:$0xff]   ;;  %v1503_v63 = vld [vmem:[%s1894_s3 + $0x110] sm:$0xff]  }
   0xe   :  { %v1501_v61 = vld [vmem:[%s1894_s3 + $0x100] sm:$0xff]   ;;  %v1504_v1 = vld [vmem:[%s1894_s3 + $0x118] sm:$0xff]   ;;  %v1506_v3 = vld [vmem:[%s1894_s3 + $0x128] sm:$0xff]  }
   0xf   :  { %1332 = vmatpush3.bf16.msra.mxu0 %v1479_v15  ;;  %v1505_v2 = vld [vmem:[%s1894_s3 + $0x120] sm:$0xff]   ;;  %v1508_v13 = vld [vmem:[%s1894_s3 + $0x138] sm:$0xff]   ;;  %v1510_v15 = vld [vmem:[%s1894_s3 + $0x148] sm:$0xff]  }
  0x10   :  { %1314 = vmatpush3.bf16.msra.mxu1 %v1472_v8  ;;  %1333 = vmatprep.subr.bf16.mxu0 %v1533_v0  ;;  %v1086_v4 = vld [vmem:[%s1896_s4 + $0x2] ss:$0 sm:$0xff] }
  0x11   :  { %1315 = vmatprep.subr.bf16.mxu1 %v1533_v0  ;;  %v1509_v14 = vld [vmem:[%s1894_s3 + $0x140] sm:$0xff]  }
  0x13   :  { %1334 = vmatpush3.bf16.msra.mxu0 %v1480_v16  ;;  %v1511_v16 = vld [vmem:[%s1894_s3 + $0x150] sm:$0xff]  }
  0x14   :  { %1316 = vmatpush3.bf16.msra.mxu1 %v1473_v9  ;;  %1335 = vmatprep.subr.bf16.mxu0 %v1533_v0 }
  0x15   :  { %1317 = vmatprep.subr.bf16.mxu1 %v1533_v0 }
  0x17   :  { %1336 = vmatpush3.bf16.msra.mxu0 %v1481_v17  ;;  %v1512_v17 = vld [vmem:[%s1894_s3 + $0x158] sm:$0xff]  }
  0x18   :  { %1318 = vmatpush3.bf16.msra.mxu1 %v1474_v10  ;;  %1337 = vmatprep.subr.bf16.mxu0 %v1533_v0 }
  0x19   :  { %1319 = vmatprep.subr.bf16.mxu1 %v1533_v0 }
  0x1b   :  { %1338 = vmatpush3.bf16.msra.mxu0 %v1482_v18  ;;  %v1513_v18 = vld [vmem:[%s1894_s3 + $0x160] sm:$0xff]  }
  0x1c   :  { %1320 = vmatpush3.bf16.msra.mxu1 %v1475_v11  ;;  %1339 = vmatprep.subr.bf16.mxu0 %v1533_v0 }
  0x1d   :  { %1321 = vmatprep.subr.bf16.mxu1 %v1533_v0 }
  0x1f   :  { %1340 = vmatpush3.bf16.msra.mxu0 %v1483_v27 }
  0x20   :  { %1322 = vmatpush3.bf16.msra.mxu1 %v1476_v12  ;;  %1341 = vmatprep.subr.bf16.mxu0 %v1533_v0  ;;  %v1507_v12 = vld [vmem:[%s1894_s3 + $0x130] sm:$0xff]  }
  0x21   :  { %1347 = vmatprep.subr.bf16.mxu1 %v1533_v0 }
  0x23   :  { %1342 = vmatpush3.bf16.msra.mxu0 %v1484_v28  ;;  %v1515_v28 = vld [vmem:[%s1894_s3 + $0x170] sm:$0xff]  }
  0x24   :  { %1367 = vmatprep.subr.bf16.mxu0 %v1533_v0 }
  0xd9   :  { %v81_v20 = vpop.f32.mrb[0].mxu0 }
  0xda   :  { %v82_v21 = vadd.f32 %v1032_v19, %v81_v20  ;;  %v1305_v22 = vpop.f32.mrb[1].mxu0  ;;  %v1514_v19 = vld [vmem:[%s1894_s3 + $0x168] sm:$0xff]   ;;  %v1112_v20 = vld [vmem:[%s1896_s4 + $0x3] ss:$0 sm:$0xff] }
  0xdb   :  { %v84_v23 = vpop.f32.mrb[2].mxu0 }
  0xdc   :  { %v87_v24 = vmax.f32 %v82_v21, 0.0  ;;  %v1306_v25 = vpop.f32.mrb[3].mxu0 }
  0xde   :  { %v88_v26 = vpack.c.bf16 %v87_v24, %v87_v24 }
  0xe0   :  { %1324 = vmatmul.mubr.bf16.vlgmr.msra.gmra.mrb[0].mxu1 %v88_v26 }
  0xe1   :  { %1363 = vmatprep.mubr.msk.bf16.mxu1 %vm1534_vm1, %v1533_v0  ;;  %1348 = vmatpush3.bf16.msra.mxu1 %v1485_v29  ;;  %v1516_v29 = vld [vmem:[%s1894_s3 + $0x178] sm:$0xff]  }
  0xe2   :  { %1349 = vmatprep.subr.bf16.mxu1 %v1533_v0 }
  0xe5   :  { %1350 = vmatpush3.bf16.msra.mxu1 %v1486_v30  ;;  %v1517_v30 = vld [vmem:[%s1894_s3 + $0x180] sm:$0xff]  }
  0xe6   :  { %1351 = vmatprep.subr.bf16.mxu1 %v1533_v0 }
  0xe9   :  { %1352 = vmatpush3.bf16.msra.mxu1 %v1487_v31  ;;  %v1518_v31 = vld [vmem:[%s1894_s3 + $0x188] sm:$0xff]  }
  0xea   :  { %1353 = vmatprep.subr.bf16.mxu1 %v1533_v0 }
  0xed   :  { %1354 = vmatpush3.bf16.msra.mxu1 %v1488_v32  ;;  %v1519_v32 = vld [vmem:[%s1894_s3 + $0x190] sm:$0xff]  }
  0xee   :  { %1355 = vmatprep.subr.bf16.mxu1 %v1533_v0 }
  0xf1   :  { %1356 = vmatpush3.bf16.msra.mxu1 %v1489_v33  ;;  %v1520_v33 = vld [vmem:[%s1894_s3 + $0x198] sm:$0xff]  }
  0xf2   :  { %1357 = vmatprep.subr.bf16.mxu1 %v1533_v0 }
  0xf5   :  { %1358 = vmatpush3.bf16.msra.mxu1 %v1490_v34  ;;  %v1521_v34 = vld [vmem:[%s1894_s3 + $0x1a0] sm:$0xff]  }
  0xf6   :  { %1359 = vmatprep.subr.bf16.mxu1 %v1533_v0 }
  0xf9   :  { %1360 = vmatpush3.bf16.msra.mxu1 %v1491_v43 }
  0xfa   :  { %1361 = vmatprep.subr.bf16.mxu1 %v1533_v0 }
  0xfd   :  { %1362 = vmatpush3.bf16.msra.mxu1 %v1492_v44  ;;  %v1523_v44 = vld [vmem:[%s1894_s3 + $0x1b0] sm:$0xff]  }
  0xfe   :  { %1387 = vmatprep.subr.bf16.mxu1 %v1533_v0 }
 0x1b3   :  { %v194_v36 = vpop.f32.mrb[0].mxu1 }
 0x1b4   :  { %v195_v37 = vadd.f32 %v1034_v35, %v194_v36  ;;  %v1325_v38 = vpop.f32.mrb[1].mxu1  ;;  %v1522_v35 = vld [vmem:[%s1894_s3 + $0x1a8] sm:$0xff]   ;;  %v1138_v36 = vld [vmem:[%s1896_s4 + $0x4] ss:$0 sm:$0xff] }
 0x1b5   :  { %v197_v39 = vpop.f32.mrb[2].mxu1 }
 0x1b6   :  { %v200_v40 = vmax.f32 %v195_v37, 0.0  ;;  %v1326_v41 = vpop.f32.mrb[3].mxu1 }
 0x1b8   :  { %v201_v42 = vpack.c.bf16 %v200_v40, %v200_v40 }
 0x1ba   :  { %1344 = vmatmul.mubr.bf16.vlgmr.msra.gmra.mrb[4].mxu0 %v201_v42 }
 0x1bb   :  { %1383 = vmatprep.mubr.msk.bf16.mxu0 %vm1534_vm1, %v1533_v0  ;;  %1368 = vmatpush3.bf16.msra.mxu0 %v1493_v45  ;;  %v1524_v45 = vld [vmem:[%s1894_s3 + $0x1b8] sm:$0xff]  }
 0x1bc   :  { %1369 = vmatprep.subr.bf16.mxu0 %v1533_v0 }
 0x1bf   :  { %1370 = vmatpush3.bf16.msra.mxu0 %v1494_v46  ;;  %v1525_v46 = vld [vmem:[%s1894_s3 + $0x1c0] sm:$0xff]  }
 0x1c0   :  { %1371 = vmatprep.subr.bf16.mxu0 %v1533_v0 }
 0x1c3   :  { %1372 = vmatpush3.bf16.msra.mxu0 %v1495_v47  ;;  %v1526_v47 = vld [vmem:[%s1894_s3 + $0x1c8] sm:$0xff]  }
 0x1c4   :  { %1373 = vmatprep.subr.bf16.mxu0 %v1533_v0 }
 0x1c7   :  { %1374 = vmatpush3.bf16.msra.mxu0 %v1496_v48  ;;  %v1527_v48 = vld [vmem:[%s1894_s3 + $0x1d0] sm:$0xff]  }
 0x1c8   :  { %1375 = vmatprep.subr.bf16.mxu0 %v1533_v0 }
 0x1cb   :  { %1376 = vmatpush3.bf16.msra.mxu0 %v1497_v49  ;;  %v1528_v49 = vld [vmem:[%s1894_s3 + $0x1d8] sm:$0xff]  }
 0x1cc   :  { %1377 = vmatprep.subr.bf16.mxu0 %v1533_v0 }
 0x1cf   :  { %1378 = vmatpush3.bf16.msra.mxu0 %v1498_v50  ;;  %v1529_v50 = vld [vmem:[%s1894_s3 + $0x1e0] sm:$0xff]  }
 0x1d0   :  { %1379 = vmatprep.subr.bf16.mxu0 %v1533_v0 }
 0x1d3   :  { %1380 = vmatpush3.bf16.msra.mxu0 %v1499_v59 }
 0x1d4   :  { %1381 = vmatprep.subr.bf16.mxu0 %v1533_v0 }
 0x1d7   :  { %1382 = vmatpush3.bf16.msra.mxu0 %v1500_v60  ;;  %v1531_v60 = vld [vmem:[%s1894_s3 + $0x1f0] sm:$0xff]  }
 0x1d8   :  { %1407 = vmatprep.subr.bf16.mxu0 %v1533_v0 }
 0x28d   :  { %v309_v52 = vpop.f32.mrb[4].mxu0 }
 0x28e   :  { %v310_v53 = vadd.f32 %v1060_v51, %v309_v52  ;;  %v1345_v54 = vpop.f32.mrb[5].mxu0  ;;  %v1530_v51 = vld [vmem:[%s1894_s3 + $0x1e8] sm:$0xff]   ;;  %v1164_v52 = vld [vmem:[%s1896_s4 + $0x5] ss:$0 sm:$0xff] }
 0x28f   :  { %v312_v55 = vpop.f32.mrb[6].mxu0 }
 0x290   :  { %v315_v56 = vmax.f32 %v310_v53, 0.0  ;;  %v1346_v57 = vpop.f32.mrb[7].mxu0 }
 0x292   :  { %v316_v58 = vpack.c.bf16 %v315_v56, %v315_v56 }
 0x294   :  { %1364 = vmatmul.mubr.bf16.vlgmr.msra.gmra.mrb[4].mxu1 %v316_v58 }
 0x295   :  { %1403 = vmatprep.mubr.msk.bf16.mxu1 %vm1534_vm1, %v1533_v0  ;;  %1388 = vmatpush3.bf16.msra.mxu1 %v1501_v61  ;;  %v1532_v61 = vld [vmem:[%s1894_s3 + $0x1f8] sm:$0xff]  }
 0x296   :  { %1389 = vmatprep.subr.bf16.mxu1 %v1533_v0 }
 0x299   :  { %1390 = vmatpush3.bf16.msra.mxu1 %v1502_v62  ;;  %v1190_v62 = vld [vmem:[%s1896_s4 + $0x6] ss:$0 sm:$0xff] }
 0x29a   :  { %1391 = vmatprep.subr.bf16.mxu1 %v1533_v0 }
 0x29d   :  { %1392 = vmatpush3.bf16.msra.mxu1 %v1503_v63 }
 0x29e   :  { %1393 = vmatprep.subr.bf16.mxu1 %v1533_v0 }
 0x2a1   :  { %1394 = vmatpush3.bf16.msra.mxu1 %v1504_v1 }
 0x2a2   :  { %1395 = vmatprep.subr.bf16.mxu1 %v1533_v0 }
 0x2a5   :  { %1396 = vmatpush3.bf16.msra.mxu1 %v1505_v2 }
 0x2a6   :  { %1397 = vmatprep.subr.bf16.mxu1 %v1533_v0 }
 0x2a9   :  { %1398 = vmatpush3.bf16.msra.mxu1 %v1506_v3 }
 0x2aa   :  { %1399 = vmatprep.subr.bf16.mxu1 %v1533_v0 }
 0x2ad   :  { %1400 = vmatpush3.bf16.msra.mxu1 %v1507_v12 }
 0x2ae   :  { %1401 = vmatprep.subr.bf16.mxu1 %v1533_v0 }
 0x2b1   :  { %1402 = vmatpush3.bf16.msra.mxu1 %v1508_v13 }
 0x2b2   :  { %1427 = vmatprep.subr.bf16.mxu1 %v1533_v0 }
 0x367   :  { %v424_v5 = vpop.f32.mrb[4].mxu1 }
 0x368   :  { %v425_v6 = vadd.f32 %v1086_v4, %v424_v5  ;;  %v1365_v7 = vpop.f32.mrb[5].mxu1 }
 0x369   :  { %v427_v8 = vpop.f32.mrb[6].mxu1  ;;  %v1216_v7 = vld [vmem:[%s1896_s4 + $0x7] ss:$0 sm:$0xff] }
 0x36a   :  { %v430_v9 = vmax.f32 %v425_v6, 0.0  ;;  %v1366_v10 = vpop.f32.mrb[7].mxu1 }
 0x36c   :  { %v431_v11 = vpack.c.bf16 %v430_v9, %v430_v9 }
 0x36e   :  { %1384 = vmatmul.mubr.bf16.vlgmr.msra.gmra.mrb[8].mxu0 %v431_v11 }
 0x36f   :  { %1423 = vmatprep.mubr.msk.bf16.mxu0 %vm1534_vm1, %v1533_v0  ;;  %1408 = vmatpush3.bf16.msra.mxu0 %v1509_v14 }
 0x370   :  { %1409 = vmatprep.subr.bf16.mxu0 %v1533_v0 }
 0x373   :  { %1410 = vmatpush3.bf16.msra.mxu0 %v1510_v15  ;;  %v1225_v15 = vld [vmem:[%s1898_s5] ss:$0 sm:$0xff] }
 0x374   :  { %1411 = vmatprep.subr.bf16.mxu0 %v1533_v0 }
 0x377   :  { %1412 = vmatpush3.bf16.msra.mxu0 %v1511_v16 }
 0x378   :  { %1413 = vmatprep.subr.bf16.mxu0 %v1533_v0 }
 0x37b   :  { %1414 = vmatpush3.bf16.msra.mxu0 %v1512_v17 }
 0x37c   :  { %1415 = vmatprep.subr.bf16.mxu0 %v1533_v0 }
 0x37f   :  { %1416 = vmatpush3.bf16.msra.mxu0 %v1513_v18 }
 0x380   :  { %1417 = vmatprep.subr.bf16.mxu0 %v1533_v0 }
 0x383   :  { %1418 = vmatpush3.bf16.msra.mxu0 %v1514_v19 }
 0x384   :  { %1419 = vmatprep.subr.bf16.mxu0 %v1533_v0 }
 0x387   :  { %1420 = vmatpush3.bf16.msra.mxu0 %v1515_v28 }
 0x388   :  { %1421 = vmatprep.subr.bf16.mxu0 %v1533_v0 }
 0x38b   :  { %1422 = vmatpush3.bf16.msra.mxu0 %v1516_v29 }
 0x38c   :  { %1447 = vmatprep.subr.bf16.mxu0 %v1533_v0 }
 0x441   :  { %v539_v21 = vpop.f32.mrb[8].mxu0 }
 0x442   :  { %v540_v22 = vadd.f32 %v1112_v20, %v539_v21  ;;  %v1385_v23 = vpop.f32.mrb[9].mxu0 }
 0x443   :  { %v542_v24 = vpop.f32.mrb[10].mxu0 }
 0x444   :  { %v545_v25 = vmax.f32 %v540_v22, 0.0  ;;  %v1386_v26 = vpop.f32.mrb[11].mxu0 }
 0x446   :  { %v546_v27 = vpack.c.bf16 %v545_v25, %v545_v25 }
 0x448   :  { %1404 = vmatmul.mubr.bf16.vlgmr.msra.gmra.mrb[8].mxu1 %v546_v27 }
 0x449   :  { %1443 = vmatprep.mubr.msk.bf16.mxu1 %vm1534_vm1, %v1533_v0  ;;  %1428 = vmatpush3.bf16.msra.mxu1 %v1517_v30 }
 0x44a   :  { %1429 = vmatprep.subr.bf16.mxu1 %v1533_v0 }
 0x44d   :  { %1430 = vmatpush3.bf16.msra.mxu1 %v1518_v31 }
 0x44e   :  { %1431 = vmatprep.subr.bf16.mxu1 %v1533_v0 }
 0x451   :  { %1432 = vmatpush3.bf16.msra.mxu1 %v1519_v32 }
 0x452   :  { %1433 = vmatprep.subr.bf16.mxu1 %v1533_v0 }
 0x455   :  { %1434 = vmatpush3.bf16.msra.mxu1 %v1520_v33 }
 0x456   :  { %1435 = vmatprep.subr.bf16.mxu1 %v1533_v0 }
 0x459   :  { %1436 = vmatpush3.bf16.msra.mxu1 %v1521_v34 }
 0x45a   :  { %1437 = vmatprep.subr.bf16.mxu1 %v1533_v0 }
 0x45d   :  { %1438 = vmatpush3.bf16.msra.mxu1 %v1522_v35 }
 0x45e   :  { %1439 = vmatprep.subr.bf16.mxu1 %v1533_v0 }
 0x461   :  { %1440 = vmatpush3.bf16.msra.mxu1 %v1523_v44 }
 0x462   :  { %1441 = vmatprep.subr.bf16.mxu1 %v1533_v0 }
 0x465   :  { %1442 = vmatpush3.bf16.msra.mxu1 %v1524_v45 }
 0x51b   :  { %v654_v37 = vpop.f32.mrb[8].mxu1 }
 0x51c   :  { %v655_v38 = vadd.f32 %v1138_v36, %v654_v37  ;;  %v1405_v39 = vpop.f32.mrb[9].mxu1 }
 0x51d   :  { %v657_v40 = vpop.f32.mrb[10].mxu1 }
 0x51e   :  { %v660_v41 = vmax.f32 %v655_v38, 0.0  ;;  %v1406_v42 = vpop.f32.mrb[11].mxu1 }
 0x520   :  { %v661_v43 = vpack.c.bf16 %v660_v41, %v660_v41 }
 0x522   :  { %1424 = vmatmul.mubr.bf16.vlgmr.msra.gmra.mrb[12].mxu0 %v661_v43 }
 0x523   :  { %1463 = vmatprep.mubr.msk.bf16.mxu0 %vm1534_vm1, %v1533_v0  ;;  %1448 = vmatpush3.bf16.msra.mxu0 %v1525_v46 }
 0x524   :  { %1449 = vmatprep.subr.bf16.mxu0 %v1533_v0 }
 0x527   :  { %1450 = vmatpush3.bf16.msra.mxu0 %v1526_v47 }
 0x528   :  { %1451 = vmatprep.subr.bf16.mxu0 %v1533_v0 }
 0x52b   :  { %1452 = vmatpush3.bf16.msra.mxu0 %v1527_v48 }
 0x52c   :  { %1453 = vmatprep.subr.bf16.mxu0 %v1533_v0 }
 0x52f   :  { %1454 = vmatpush3.bf16.msra.mxu0 %v1528_v49 }
 0x530   :  { %1455 = vmatprep.subr.bf16.mxu0 %v1533_v0 }
 0x533   :  { %1456 = vmatpush3.bf16.msra.mxu0 %v1529_v50 }
 0x534   :  { %1457 = vmatprep.subr.bf16.mxu0 %v1533_v0 }
 0x537   :  { %1458 = vmatpush3.bf16.msra.mxu0 %v1530_v51 }
 0x538   :  { %1459 = vmatprep.subr.bf16.mxu0 %v1533_v0 }
 0x53b   :  { %1460 = vmatpush3.bf16.msra.mxu0 %v1531_v60 }
 0x53c   :  { %1461 = vmatprep.subr.bf16.mxu0 %v1533_v0  ;;  %v12_v0 = vstv %s1897_s6 }
 0x53d   :  { %13 = vst [vmem:[#allocation2] sm:$0x1] %v12_v0 }
 0x53f   :  { %1462 = vmatpush3.bf16.msra.mxu0 %v1532_v61 }
 0x544   :  { %v1226_v18 = vld [vmem:[#allocation2] ss:$0 sm:$0xff] }
 0x5f5   :  { %v769_v53 = vpop.f32.mrb[12].mxu0 }
 0x5f6   :  { %v770_v54 = vadd.f32 %v1164_v52, %v769_v53  ;;  %v1425_v55 = vpop.f32.mrb[13].mxu0 }
 0x5f7   :  { %v772_v56 = vpop.f32.mrb[14].mxu0 }
 0x5f8   :  { %v775_v57 = vmax.f32 %v770_v54, 0.0  ;;  %v1426_v58 = vpop.f32.mrb[15].mxu0 }
 0x5fa   :  { %v776_v59 = vpack.c.bf16 %v775_v57, %v775_v57 }
 0x5fc   :  { %1444 = vmatmul.mubr.bf16.vlgmr.msra.gmra.mrb[12].mxu1 %v776_v59 }
 0x6cf   :  { %v884_v63 = vpop.f32.mrb[12].mxu1 }
 0x6d0   :  { %v885_v1 = vadd.f32 %v1190_v62, %v884_v63  ;;  %v1445_v2 = vpop.f32.mrb[13].mxu1 }
 0x6d1   :  { %v887_v3 = vpop.f32.mrb[14].mxu1 }
 0x6d2   :  { %v890_v4 = vmax.f32 %v885_v1, 0.0  ;;  %v1446_v5 = vpop.f32.mrb[15].mxu1 }
 0x6d4   :  { %v891_v6 = vpack.c.bf16 %v890_v4, %v890_v4 }
 0x6d6   :  { %1464 = vmatmul.mubr.bf16.vlgmr.msra.gmra.mrb[16].mxu0 %v891_v6 }
 0x7a9   :  { %v999_v8 = vpop.f32.mrb[16].mxu0 }
 0x7aa   :  { %v1000_v9 = vadd.f32 %v1216_v7, %v999_v8  ;;  %v1465_v10 = vpop.f32.mrb[17].mxu0 }
 0x7ab   :  { %v1002_v11 = vpop.f32.mrb[18].mxu0 }
 0x7ac   :  { %v1005_v12 = vmax.f32 %v1000_v9, 0.0  ;;  %v1466_v13 = vpop.f32.mrb[19].mxu0 }
 0x7ae   :  { %v1006_v14 = vpack.c.bf16 %v1005_v12, %v1005_v12 }
 0x7b0   :  { %v1007_v16 = vunpack.c.l.bf16 %v1006_v14 }
 0x7b2   :  { %v1015_v17 = vmul.f32 %v1225_v15, %v1007_v16 }
 0x7b4   :  { %1016 = vadd.xlane.f32.xlu0 %v1015_v17 }
 0x841   :  { %v1017_v19 = vpop.xlane.xlu0 %1016 }
 0x842   :  { %v1025_v20 = vadd.f32 %v1226_v18, %v1017_v19 }
 0x844   :  { %1027 = vst.msk [vmem:[%s1899_s7] sm:$0xff] %vm1026_vm3, %v1025_v20 }

</bundles_post_ra>
